<compile_context>
chip_gen: v7x
topology: tpu7x:2x2x1
jax: 0.10.0
libtpu: 0.0.40
codegen_flags: <defaults>
</compile_context>

<pallas_src>
import jax
import jax.numpy as jnp
from jax.experimental import pallas as pl
from jax.experimental.pallas import tpu as pltpu

N_IN = 20         # input features
N_OUT = 4         # real logits (and the output array width)
H_PAD = 128       # hidden 100 -> 128 (zero padded)
OUT_PAD = 128     # width of the final dot on the MXU; only first N_OUT lanes stored
TB_DEFAULT = 1024  # batch tile; sweep 1024-2048 for large batches


def _mlp_kernel(x_ref,
                w1_ref, b1_ref,
                w2_ref, b2_ref,
                w3_ref, b3_ref,
                w4_ref, b4_ref,
                o_ref):
    # x arrives as f32 from HBM; cast to bf16 on the VPU (hidden under the DMA).
    # Matmuls on the MXU in bf16 with f32 accumulation; bias add + ReLU in f32.
    x = x_ref[...].astype(jnp.bfloat16)

    # Linear(20, 128pad) + ReLU
    h = jnp.dot(x, w1_ref[...], preferred_element_type=jnp.float32) + b1_ref[...]
    h = jnp.maximum(h, 0.0).astype(jnp.bfloat16)

    # Linear(128pad, 128pad) + ReLU
    h = jnp.dot(h, w2_ref[...], preferred_element_type=jnp.float32) + b2_ref[...]
    h = jnp.maximum(h, 0.0).astype(jnp.bfloat16)

    # Linear(128pad, 128pad) + Dropout(identity at eval) + ReLU
    h = jnp.dot(h, w3_ref[...], preferred_element_type=jnp.float32) + b3_ref[...]
    h = jnp.maximum(h, 0.0).astype(jnp.bfloat16)

    # Linear(128pad, 128pad): full-width dot, then store only the real logit lanes.
    logits_pad = (jnp.dot(h, w4_ref[...], preferred_element_type=jnp.float32)
                  + b4_ref[...])
    o_ref[...] = logits_pad[:, :N_OUT].astype(o_ref.dtype)


def _round_up(n, m):
    return ((n + m - 1) // m) * m


def phone_price_classifier(x, prepped, *, tb=TB_DEFAULT):
    """x: (B, 20) float32. prepped: padded/bf16 params from prepare_params()."""
    B = x.shape[0]
    # Batch-tile selection:
    #  * multiple of 16 (bf16 intermediates pack 16 sublanes per vreg),
    #  * capped so large batches produce >= ~4 grid steps (v7x megacore split),
    #  * never larger than needed for tiny batches.
    tb = max(16, min(tb, _round_up(pl.cdiv(max(B, 1), 4), 16)))
    grid = (pl.cdiv(B, tb),)

    def const_spec(a):
        # full-array block, same VMEM-resident tile on every grid step
        return pl.BlockSpec(a.shape, lambda i: (0,) * a.ndim)

    operands = (x,
                prepped["w1"], prepped["b1"],
                prepped["w2"], prepped["b2"],
                prepped["w3"], prepped["b3"],
                prepped["w4"], prepped["b4"])

    in_specs = [pl.BlockSpec((tb, N_IN), lambda i: (i, 0))] + \
               [const_spec(a) for a in operands[1:]]

    return pl.pallas_call(
        _mlp_kernel,
        out_shape=jax.ShapeDtypeStruct((B, N_OUT), jnp.float32),
        grid=grid,
        in_specs=in_specs,
        # last dim (N_OUT) equals the full array dim -> legal narrow block; masked
        # vst cost is negligible because per-tile store volume is tiny.
        out_specs=pl.BlockSpec((tb, N_OUT), lambda i: (i, 0)),
        compiler_params=pltpu.CompilerParams(
            dimension_semantics=("parallel",)),   # shard batch across v7x's 2 TCs
    )(*operands)


def init_params(key):
    """nn.Linear-equivalent init; weights stored (in, out), biases (1, out), f32."""
    dims = [(N_IN, 100), (100, 100), (100, 100), (100, N_OUT)]
    params = {}
    for idx, (d_in, d_out) in enumerate(dims, start=1):
        key, kw, kb = jax.random.split(key, 3)
        bound = 1.0 / jnp.sqrt(d_in)
        params[f"w{idx}"] = jax.random.uniform(
            kw, (d_in, d_out), jnp.float32, minval=-bound, maxval=bound)
        params[f"b{idx}"] = jax.random.uniform(
            kb, (1, d_out), jnp.float32, minval=-bound, maxval=bound)
    return params


def prepare_params(params):
    """Zero-pad hidden/output dims to 128 and cast weights to bf16 (biases stay f32).

    Padded weight rows/cols and padded bias lanes are exactly zero, so padded hidden
    lanes carry ReLU(0 + 0) = 0 and never leak into real outputs.
    """
    def pad_to(a, shape):
        return jnp.pad(a, [(0, s - d) for d, s in zip(a.shape, shape)])

    p = {}
    p["w1"] = pad_to(params["w1"], (N_IN, H_PAD)).astype(jnp.bfloat16)
    p["b1"] = pad_to(params["b1"], (1, H_PAD))
    p["w2"] = pad_to(params["w2"], (H_PAD, H_PAD)).astype(jnp.bfloat16)
    p["b2"] = pad_to(params["b2"], (1, H_PAD))
    p["w3"] = pad_to(params["w3"], (H_PAD, H_PAD)).astype(jnp.bfloat16)
    p["b3"] = pad_to(params["b3"], (1, H_PAD))
    p["w4"] = pad_to(params["w4"], (H_PAD, OUT_PAD)).astype(jnp.bfloat16)
    p["b4"] = pad_to(params["b4"], (1, OUT_PAD))
    return p


def reference_forward_mirrored(x, p):
    """Pure-JAX reference with the exact same bf16/f32 mixed-precision math."""
    h = x.astype(jnp.bfloat16)
    h = jnp.maximum(jnp.dot(h, p["w1"], preferred_element_type=jnp.float32)
                    + p["b1"], 0.0).astype(jnp.bfloat16)
    h = jnp.maximum(jnp.dot(h, p["w2"], preferred_element_type=jnp.float32)
                    + p["b2"], 0.0).astype(jnp.bfloat16)
    h = jnp.maximum(jnp.dot(h, p["w3"], preferred_element_type=jnp.float32)
                    + p["b3"], 0.0).astype(jnp.bfloat16)
    out = jnp.dot(h, p["w4"], preferred_element_type=jnp.float32) + p["b4"]
    return out[:, :N_OUT]


def reference_forward_f32(x, params):
    """Full-f32 reference matching the original PyTorch module's math."""
    h = jnp.maximum(x @ params["w1"] + params["b1"], 0.0)
    h = jnp.maximum(h @ params["w2"] + params["b2"], 0.0)
    h = jnp.maximum(h @ params["w3"] + params["b3"], 0.0)
    return h @ params["w4"] + params["b4"]


if __name__ == "__main__":
    key = jax.random.PRNGKey(0)
    key, kx = jax.random.split(key)

    batch = 2
    x = jax.random.normal(kx, (batch, N_IN), dtype=jnp.float32)
    params = init_params(key)
    prepped = prepare_params(params)

    logits = phone_price_classifier(x, prepped)
    logits = jax.block_until_ready(logits)
    assert logits.shape == (batch, N_OUT), logits.shape

    ref = reference_forward_mirrored(x, prepped)
    assert jnp.allclose(logits, ref, atol=1e-2, rtol=1e-2), (
        "mismatch vs bf16-mirrored JAX reference")

    ref32 = reference_forward_f32(x, params)
    assert jnp.allclose(logits, ref32, atol=2e-1, rtol=2e-1), (
        "mismatch vs f32 JAX reference (beyond bf16 tolerance)")

    print("KERNEL_OK")
</pallas_src>

<mosaic_0001>
module attributes {stable_mosaic.version = 11 : i64} {
  func.func @_mlp_kernel(%arg0: i32, %arg1: memref<16x20xf32, #tpu.memory_space<vmem>>, %arg2: memref<20x128xbf16, #tpu.memory_space<vmem>>, %arg3: memref<1x128xf32, #tpu.memory_space<vmem>>, %arg4: memref<128x128xbf16, #tpu.memory_space<vmem>>, %arg5: memref<1x128xf32, #tpu.memory_space<vmem>>, %arg6: memref<128x128xbf16, #tpu.memory_space<vmem>>, %arg7: memref<1x128xf32, #tpu.memory_space<vmem>>, %arg8: memref<128x128xbf16, #tpu.memory_space<vmem>>, %arg9: memref<1x128xf32, #tpu.memory_space<vmem>>, %arg10: memref<16x4xf32, #tpu.memory_space<vmem>>) attributes {dimension_semantics = [#tpu.dimension_semantics<parallel>], iteration_bounds = array<i64: 1>, scalar_prefetch = 0 : i64, scratch_operands = 0 : i64, tpu.core_type = #tpu.core_type<tc>, window_params = [{transform_indices = @transform_0, window_bounds = array<i64: 16, 20>}, {pipeline_mode = #tpu.pipeline_mode<synchronous>, transform_indices = @transform_1, window_bounds = array<i64: 20, 128>}, {pipeline_mode = #tpu.pipeline_mode<synchronous>, transform_indices = @transform_2, window_bounds = array<i64: 1, 128>}, {pipeline_mode = #tpu.pipeline_mode<synchronous>, transform_indices = @transform_3, window_bounds = array<i64: 128, 128>}, {pipeline_mode = #tpu.pipeline_mode<synchronous>, transform_indices = @transform_4, window_bounds = array<i64: 1, 128>}, {pipeline_mode = #tpu.pipeline_mode<synchronous>, transform_indices = @transform_5, window_bounds = array<i64: 128, 128>}, {pipeline_mode = #tpu.pipeline_mode<synchronous>, transform_indices = @transform_6, window_bounds = array<i64: 1, 128>}, {pipeline_mode = #tpu.pipeline_mode<synchronous>, transform_indices = @transform_7, window_bounds = array<i64: 128, 128>}, {pipeline_mode = #tpu.pipeline_mode<synchronous>, transform_indices = @transform_8, window_bounds = array<i64: 1, 128>}, {transform_indices = @transform_9, window_bounds = array<i64: 16, 4>}]} {
    %c0 = arith.constant 0 : index
    %c0_0 = arith.constant 0 : index
    %0 = vector.load %arg1[%c0, %c0_0] : memref<16x20xf32, #tpu.memory_space<vmem>>, vector<16x20xf32>
    %1 = arith.truncf %0 : vector<16x20xf32> to vector<16x20xbf16>
    %c0_1 = arith.constant 0 : index
    %c0_2 = arith.constant 0 : index
    %2 = vector.load %arg2[%c0_1, %c0_2] : memref<20x128xbf16, #tpu.memory_space<vmem>>, vector<20x128xbf16>
    %cst = arith.constant dense<0.000000e+00> : vector<16x128xf32>
    %3 = tpu.matmul %1, %2, %cst {dimension_numbers = #tpu.dot_dimension_numbers<[1], [0], [0], [1], [0, 0, 1, 1], [], []>} : vector<16x20xbf16>, vector<20x128xbf16>, vector<16x128xf32> -> vector<16x128xf32>
    %c0_3 = arith.constant 0 : index
    %c0_4 = arith.constant 0 : index
    %4 = vector.load %arg3[%c0_3, %c0_4] : memref<1x128xf32, #tpu.memory_space<vmem>>, vector<1x128xf32>
    %5 = vector.broadcast %4 : vector<1x128xf32> to vector<16x128xf32>
    %6 = arith.addf %3, %5 : vector<16x128xf32>
    %cst_5 = arith.constant 0.000000e+00 : f32
    %7 = vector.broadcast %cst_5 : f32 to vector<16x128xf32>
    %8 = arith.maximumf %6, %7 : vector<16x128xf32>
    %9 = arith.truncf %8 : vector<16x128xf32> to vector<16x128xbf16>
    %c0_6 = arith.constant 0 : index
    %c0_7 = arith.constant 0 : index
    %10 = vector.load %arg4[%c0_6, %c0_7] : memref<128x128xbf16, #tpu.memory_space<vmem>>, vector<128x128xbf16>
    %cst_8 = arith.constant dense<0.000000e+00> : vector<16x128xf32>
    %11 = tpu.matmul %9, %10, %cst_8 {dimension_numbers = #tpu.dot_dimension_numbers<[1], [0], [0], [1], [0, 0, 1, 1], [], []>} : vector<16x128xbf16>, vector<128x128xbf16>, vector<16x128xf32> -> vector<16x128xf32>
    %c0_9 = arith.constant 0 : index
    %c0_10 = arith.constant 0 : index
    %12 = vector.load %arg5[%c0_9, %c0_10] : memref<1x128xf32, #tpu.memory_space<vmem>>, vector<1x128xf32>
    %13 = vector.broadcast %12 : vector<1x128xf32> to vector<16x128xf32>
    %14 = arith.addf %11, %13 : vector<16x128xf32>
    %cst_11 = arith.constant 0.000000e+00 : f32
    %15 = vector.broadcast %cst_11 : f32 to vector<16x128xf32>
    %16 = arith.maximumf %14, %15 : vector<16x128xf32>
    %17 = arith.truncf %16 : vector<16x128xf32> to vector<16x128xbf16>
    %c0_12 = arith.constant 0 : index
    %c0_13 = arith.constant 0 : index
    %18 = vector.load %arg6[%c0_12, %c0_13] : memref<128x128xbf16, #tpu.memory_space<vmem>>, vector<128x128xbf16>
    %cst_14 = arith.constant dense<0.000000e+00> : vector<16x128xf32>
    %19 = tpu.matmul %17, %18, %cst_14 {dimension_numbers = #tpu.dot_dimension_numbers<[1], [0], [0], [1], [0, 0, 1, 1], [], []>} : vector<16x128xbf16>, vector<128x128xbf16>, vector<16x128xf32> -> vector<16x128xf32>
    %c0_15 = arith.constant 0 : index
    %c0_16 = arith.constant 0 : index
    %20 = vector.load %arg7[%c0_15, %c0_16] : memref<1x128xf32, #tpu.memory_space<vmem>>, vector<1x128xf32>
    %21 = vector.broadcast %20 : vector<1x128xf32> to vector<16x128xf32>
    %22 = arith.addf %19, %21 : vector<16x128xf32>
    %cst_17 = arith.constant 0.000000e+00 : f32
    %23 = vector.broadcast %cst_17 : f32 to vector<16x128xf32>
    %24 = arith.maximumf %22, %23 : vector<16x128xf32>
    %25 = arith.truncf %24 : vector<16x128xf32> to vector<16x128xbf16>
    %c0_18 = arith.constant 0 : index
    %c0_19 = arith.constant 0 : index
    %26 = vector.load %arg8[%c0_18, %c0_19] : memref<128x128xbf16, #tpu.memory_space<vmem>>, vector<128x128xbf16>
    %cst_20 = arith.constant dense<0.000000e+00> : vector<16x128xf32>
    %27 = tpu.matmul %25, %26, %cst_20 {dimension_numbers = #tpu.dot_dimension_numbers<[1], [0], [0], [1], [0, 0, 1, 1], [], []>} : vector<16x128xbf16>, vector<128x128xbf16>, vector<16x128xf32> -> vector<16x128xf32>
    %c0_21 = arith.constant 0 : index
    %c0_22 = arith.constant 0 : index
    %28 = vector.load %arg9[%c0_21, %c0_22] : memref<1x128xf32, #tpu.memory_space<vmem>>, vector<1x128xf32>
    %29 = vector.broadcast %28 : vector<1x128xf32> to vector<16x128xf32>
    %30 = arith.addf %27, %29 : vector<16x128xf32>
    %31 = vector.extract_strided_slice %30 {offsets = [0, 0], sizes = [16, 4], strides = [1, 1]} : vector<16x128xf32> to vector<16x4xf32>
    %c0_23 = arith.constant 0 : index
    %c0_24 = arith.constant 0 : index
    %32 = vector.load %arg10[%c0_23, %c0_24] : memref<16x4xf32, #tpu.memory_space<vmem>>, vector<16x4xf32>
    tpu.vector_store %arg10[%c0_23, %c0_24], %31 {strides = array<i32>} : memref<16x4xf32, #tpu.memory_space<vmem>>, vector<16x4xf32>,
    return
  }
  func.func @transform_0(%arg0: i32) -> (i32, i32) {
    %c0_i32 = arith.constant 0 : i32
    %c0_i32_0 = arith.constant 0 : i32
    return %arg0, %c0_i32 : i32, i32
  }
  func.func @transform_1(%arg0: i32) -> (i32, i32) {
    %c0_i32 = arith.constant 0 : i32
    %c0_i32_0 = arith.constant 0 : i32
    %c0_i32_1 = arith.constant 0 : i32
    return %c0_i32, %c0_i32_0 : i32, i32
  }
  func.func @transform_2(%arg0: i32) -> (i32, i32) {
    %c0_i32 = arith.constant 0 : i32
    %c0_i32_0 = arith.constant 0 : i32
    %c0_i32_1 = arith.constant 0 : i32
    return %c0_i32, %c0_i32_0 : i32, i32
  }
  func.func @transform_3(%arg0: i32) -> (i32, i32) {
    %c0_i32 = arith.constant 0 : i32
    %c0_i32_0 = arith.constant 0 : i32
    %c0_i32_1 = arith.constant 0 : i32
    return %c0_i32, %c0_i32_0 : i32, i32
  }
  func.func @transform_4(%arg0: i32) -> (i32, i32) {
    %c0_i32 = arith.constant 0 : i32
    %c0_i32_0 = arith.constant 0 : i32
    %c0_i32_1 = arith.constant 0 : i32
    return %c0_i32, %c0_i32_0 : i32, i32
  }
  func.func @transform_5(%arg0: i32) -> (i32, i32) {
    %c0_i32 = arith.constant 0 : i32
    %c0_i32_0 = arith.constant 0 : i32
    %c0_i32_1 = arith.constant 0 : i32
    return %c0_i32, %c0_i32_0 : i32, i32
  }
  func.func @transform_6(%arg0: i32) -> (i32, i32) {
    %c0_i32 = arith.constant 0 : i32
    %c0_i32_0 = arith.constant 0 : i32
    %c0_i32_1 = arith.constant 0 : i32
    return %c0_i32, %c0_i32_0 : i32, i32
  }
  func.func @transform_7(%arg0: i32) -> (i32, i32) {
    %c0_i32 = arith.constant 0 : i32
    %c0_i32_0 = arith.constant 0 : i32
    %c0_i32_1 = arith.constant 0 : i32
    return %c0_i32, %c0_i32_0 : i32, i32
  }
  func.func @transform_8(%arg0: i32) -> (i32, i32) {
    %c0_i32 = arith.constant 0 : i32
    %c0_i32_0 = arith.constant 0 : i32
    %c0_i32_1 = arith.constant 0 : i32
    return %c0_i32, %c0_i32_0 : i32, i32
  }
  func.func @transform_9(%arg0: i32) -> (i32, i32) {
    %c0_i32 = arith.constant 0 : i32
    %c0_i32_0 = arith.constant 0 : i32
    return %arg0, %c0_i32 : i32, i32
  }
}

</mosaic_0001>

<bundles_post_ra>
// kernel: tpu_custom_call.1
= control target key start
LH: loop header
LB: loop body
LE: loop exit
PB: predicated region body
PF: predicated region fallthrough
CT: control target
= control target key end

     0   :  { %14 = vsyncpa [#allocation3], 0  ;;  %s1045_s0 = inlined_call_operand.hbm [shape: f32[2,20], index: 0, kind: input, shape index: {}]   ;;  %s1046_s1 = inlined_call_operand.hbm [shape: bf16[20,128], index: 1, kind: input, shape index: {}]   ;;  %s1047_s2 = inlined_call_operand.vmem [shape: f32[1,128], index: 2, kind: input, shape index: {}]   ;;  %s1048_s3 = inlined_call_operand.hbm [shape: bf16[128,128], index: 3, kind: input, shape index: {}]   ;;  %s1049_s4 = inlined_call_operand.vmem [shape: f32[1,128], index: 4, kind: input, shape index: {}]   ;;  %s1050_s5 = inlined_call_operand.hbm [shape: bf16[128,128], index: 5, kind: input, shape index: {}]   ;;  %s1051_s6 = inlined_call_operand.vmem [shape: f32[1,128], index: 6, kind: input, shape index: {}]   ;;  %s1052_s7 = inlined_call_operand.hbm [shape: bf16[128,128], index: 7, kind: input, shape index: {}]   ;;  %s1053_s8 = inlined_call_operand.vmem [shape: f32[1,128], index: 8, kind: input, shape index: {}]   ;;  %s1054_s9 = inlined_call_operand.hbm [shape: f32[2,4], index: 9, kind: output, shape index: {}]  }
   0x1   :  { %15 = vsyncpa [#allocation6], 0 }
   0x2   :  { %16 = vsyncpa [#allocation9], 0 }
   0x3   :  { %17 = vsyncpa [#allocation4], 0 }
   0x4   :  { %22 = vsyncadd [#allocation3], 224  ;;  %s847_s30 = smov [#allocation5]   ;;  %s707_s13 = scalar_lea.hbm %s1046_s1, 192 }
   0x5   :  { %s35_s10 = sshll.u32 %s847_s30, 4  ;;  %p708_p0 = scmp.ne.s32.totalorder %s1046_s1, %s707_s13  ;;  %s36_s10 = int_to_ptr.vmem [resolvable:$true] %s35_s10 }
   0x6   :  { %p711_p1 = scmp.lt.u32.totalorder %s707_s13, %s1046_s1 }
   0x8   :  { %p713_p2 = pnand %p711_p1, %p708_p0 }
   0xa   :  { %716 = shalt.err (!%p713_p2)
}
   0xb   :  { %s717_s18 = scalar_lea.vmem %s36_s10, 192  ;;  %p722_p4 = scmp.lt.s32.totalorder %s36_s10, %s36_s10 }
   0xc   :  { %p718_p3 = scmp.ne.s32.totalorder %s36_s10, %s717_s18  ;;  %p723_p5 = scmp.lt.s32.totalorder %s717_s18, %s717_s18 }
   0xe   :  { %p724_p6 = por %p723_p5, %p722_p4 }
  0x10   :  { %p725_p7 = pnand %p724_p6, %p718_p3 }
  0x12   :  { %728 = shalt.err (!%p725_p7)
}
  0x13   :  { %s848_s19 = smov 64   ;;  %s849_s20 = smov 4  }
  0x14   :  { %41 = dma.hbm_to_vmem [thread:$0]  %s1046_s1, 192, %s36_s10, [#allocation6], %s848_s19, %s848_s19, %s849_s20  }
  0x15   :  { %s850_s23 = smov [#allocation8]   ;;  %s851_s25 = smov [#allocation2]  }
  0x16   :  { %s63_s24 = sshll.u32 %s850_s23, 4  ;;  %s23_s26 = sshll.u32 %s851_s25, 4  ;;  %s64_s24 = int_to_ptr.vmem [resolvable:$true] %s63_s24  ;;  %s24_s26 = int_to_ptr.vmem [resolvable:$true] %s23_s26 }
  0x17   :  { %s729_s29 = scalar_lea.hbm %s1050_s5, 1024 }
  0x18   :  { %p730_p8 = scmp.ne.s32.totalorder %s1050_s5, %s729_s29  ;;  %p733_p9 = scmp.lt.u32.totalorder %s729_s29, %s1050_s5 }
  0x1a   :  { %p735_p10 = pnand %p733_p9, %p730_p8 }
  0x1c   :  { %738 = shalt.err (!%p735_p10)
}
  0x1d   :  { %s739_s1 = scalar_lea.vmem %s64_s24, 1024  ;;  %p744_p12 = scmp.lt.s32.totalorder %s64_s24, %s64_s24 }
  0x1e   :  { %p740_p11 = scmp.ne.s32.totalorder %s64_s24, %s739_s1  ;;  %p745_p13 = scmp.lt.s32.totalorder %s739_s1, %s739_s1 }
  0x20   :  { %p746_p0 = por %p745_p13, %p744_p12 }
  0x22   :  { %p747_p1 = pnand %p746_p0, %p740_p11 }
  0x24   :  { %750 = shalt.err (!%p747_p1)
}
  0x25   :  { %69 = dma.hbm_to_vmem [thread:$0]  %s1050_s5, 1024, %s64_s24, [#allocation9], %s848_s19, %s848_s19, %s849_s20  }
  0x26   :  { %s751_s17 = scalar_lea.hbm %s1045_s0, 32 }
  0x27   :  { %p752_p2 = scmp.ne.s32.totalorder %s1045_s0, %s751_s17  ;;  %p755_p3 = scmp.lt.u32.totalorder %s751_s17, %s1045_s0 }
  0x29   :  { %p757_p4 = pnand %p755_p3, %p752_p2 }
  0x2b   :  { %760 = shalt.err (!%p757_p4)
}
  0x2c   :  { %s761_s25 = scalar_lea.vmem %s24_s26, 32  ;;  %s765_s27 = scalar_lea.vmem %s24_s26, 256 }
  0x2d   :  { %p762_p5 = scmp.ne.s32.totalorder %s24_s26, %s761_s25  ;;  %p766_p6 = scmp.lt.s32.totalorder %s24_s26, %s24_s26 }
  0x2e   :  { %p767_p7 = scmp.lt.s32.totalorder %s765_s27, %s761_s25 }
  0x30   :  { %p768_p8 = por %p767_p7, %p766_p6 }
  0x32   :  { %p769_p9 = pnand %p768_p8, %p762_p5 }
  0x34   :  { %772 = shalt.err (!%p769_p9)
}
  0x35   :  { %s852_s5 = smov 32   ;;  %s853_s24 = smov 2  }
  0x36   :  { %29 = dma.hbm_to_vmem [thread:$0]  %s1045_s0, 32, %s24_s26, [#allocation3], %s852_s5, %s852_s5, %s853_s24  }
  0x37   :  { %s854_s30 = smov [#allocation7]   ;;  %s855_s12 = smov [#allocation10]  }
  0x38   :  { %s49_s11 = sshll.u32 %s854_s30, 4  ;;  %s77_s13 = sshll.u32 %s855_s12, 4  ;;  %s50_s11 = int_to_ptr.vmem [resolvable:$true] %s49_s11  ;;  %s78_s13 = int_to_ptr.vmem [resolvable:$true] %s77_s13 }
  0x39   :  { %s773_s14 = scalar_lea.hbm %s1048_s3, 1024 }
  0x3a   :  { %p774_p10 = scmp.ne.s32.totalorder %s1048_s3, %s773_s14  ;;  %p777_p11 = scmp.lt.u32.totalorder %s773_s14, %s1048_s3 }
  0x3c   :  { %p779_p12 = pnand %p777_p11, %p774_p10 }
  0x3e   :  { %782 = shalt.err (!%p779_p12)
}
  0x3f   :  { %s783_s0 = scalar_lea.vmem %s50_s11, 1024  ;;  %p788_p0 = scmp.lt.s32.totalorder %s50_s11, %s50_s11 }
  0x40   :  { %p784_p13 = scmp.ne.s32.totalorder %s50_s11, %s783_s0  ;;  %p789_p1 = scmp.lt.s32.totalorder %s783_s0, %s783_s0 }
  0x42   :  { %p790_p2 = por %p789_p1, %p788_p0 }
  0x44   :  { %p791_p3 = pnand %p790_p2, %p784_p13 }
  0x46   :  { %794 = shalt.err (!%p791_p3)
}
  0x47   :  { %55 = dma.hbm_to_vmem [thread:$0]  %s1048_s3, 1024, %s50_s11, [#allocation6], %s848_s19, %s848_s19, %s849_s20  }
  0x48   :  { %s795_s25 = scalar_lea.hbm %s1052_s7, 1024 }
  0x49   :  { %p796_p4 = scmp.ne.s32.totalorder %s1052_s7, %s795_s25  ;;  %p799_p5 = scmp.lt.u32.totalorder %s795_s25, %s1052_s7 }
  0x4b   :  { %p801_p6 = pnand %p799_p5, %p796_p4 }
  0x4d   :  { %804 = shalt.err (!%p801_p6)
}
  0x4e   :  { %s805_s12 = scalar_lea.vmem %s78_s13, 1024  ;;  %p810_p8 = scmp.lt.s32.totalorder %s78_s13, %s78_s13 }
  0x4f   :  { %p806_p7 = scmp.ne.s32.totalorder %s78_s13, %s805_s12  ;;  %p811_p9 = scmp.lt.s32.totalorder %s805_s12, %s805_s12 }
  0x51   :  { %p812_p10 = por %p811_p9, %p810_p8 }
  0x53   :  { %p813_p11 = pnand %p812_p10, %p806_p7 }
  0x55   :  { %816 = shalt.err (!%p813_p11)
}
  0x56   :  { %83 = dma.hbm_to_vmem [thread:$0]  %s1052_s7, 1024, %s78_s13, [#allocation9], %s848_s19, %s848_s19, %s849_s20  }
  0x57   :  { %839 = dma.done.wait [#allocation3], 256  }
  0x58   :  { %840 = vsyncadd [#allocation3], 4294967040 }
  0x59   :  { %841 = dma.done.wait [#allocation6], 1216  }
  0x5a   :  { %842 = vsyncadd [#allocation6], 4294966080 }
  0x5b   :  { %843 = dma.done.wait [#allocation9], 2048  }
  0x5c   :  { %844 = vsyncadd [#allocation9], 4294965248  ;;  %v856_v0 = vmov 0.0   ;;  %vm857_vm0 = vmmov 0   ;;  %v681_v1 = vld [vmem:[#allocation5] sm:$0xff]   ;;  %vm128_vm1 = vcmask 1041408  }
  0x5d   :  { %601 = vmatprep.subr.bf16.mxu0 %v856_v0  ;;  %605 = vmatprep.mubr.msk.bf16.mxu0 %vm857_vm0, %v856_v0  ;;  %v682_v2 = vld [vmem:[#allocation5 + $0x8] ss:$0 sps:$4 sm:$0x33]   ;;  %v102_v3 = vld [vmem:[#allocation2] sm:$0xff]  ;;  %v103_v4 = vld [vmem:[#allocation2 + $0x8] sm:$0xff]  ;;  %vm124_vm2 = vcmask 162816  }
  0x5e   :  { %609 = vmatprep.subr.bf16.mxu1 %v856_v0  ;;  %625 = vmatprep.mubr.msk.bf16.mxu1 %vm857_vm0, %v856_v0  ;;  %v130_v5 = vsel %vm128_vm1, %v682_v2, 0  ;;  %v683_v6 = vld [vmem:[#allocation7] sm:$0xff]   ;;  %v104_v7 = vpack.c.bf16 %v103_v4, %v102_v3  ;;  %v684_v8 = vld [vmem:[#allocation7 + $0x8] sm:$0xff]   ;;  %v685_v9 = vld [vmem:[#allocation7 + $0x10] sm:$0xff]   ;;  %vm518_vm3 = vcmask 31744  }
  0x5f   :  { %602 = vmatpush3.bf16.msra.mxu0 %v681_v1  ;;  %610 = vmatpush3.bf16.msra.mxu1 %v683_v6  ;;  %v686_v10 = vld [vmem:[#allocation7 + $0x18] sm:$0xff]   ;;  %v687_v11 = vld [vmem:[#allocation7 + $0x20] sm:$0xff]   ;;  %v688_v12 = vld [vmem:[#allocation7 + $0x28] sm:$0xff]  }
  0x60   :  { %603 = vmatprep.subr.bf16.mxu0 %v856_v0  ;;  %611 = vmatprep.subr.bf16.mxu1 %v856_v0  ;;  %v689_v13 = vld [vmem:[#allocation7 + $0x30] sm:$0xff]   ;;  %v690_v14 = vld [vmem:[#allocation7 + $0x38] sm:$0xff]   ;;  %v691_v15 = vld [vmem:[#allocation8] sm:$0xff]  }
  0x61   :  { %v692_v16 = vld [vmem:[#allocation8 + $0x8] sm:$0xff]   ;;  %v693_v17 = vld [vmem:[#allocation8 + $0x10] sm:$0xff]   ;;  %v694_v18 = vld [vmem:[#allocation8 + $0x18] sm:$0xff]  }
  0x62   :  { %v695_v19 = vld [vmem:[#allocation8 + $0x20] sm:$0xff]   ;;  %v696_v20 = vld [vmem:[#allocation8 + $0x28] sm:$0xff]   ;;  %v697_v31 = vld [vmem:[#allocation8 + $0x30] sm:$0xff]  }
  0x63   :  { %604 = vmatpush3.bf16.msra.mxu0 %v130_v5  ;;  %612 = vmatpush3.bf16.msra.mxu1 %v684_v8  ;;  %v540_v21 = vld [vmem:[%s1047_s2] ss:$0 sm:$0xff]  ;;  %v698_v32 = vld [vmem:[#allocation8 + $0x38] sm:$0xff]   ;;  %v700_v34 = vld [vmem:[#allocation10 + $0x8] sm:$0xff]  }
  0x64   :  { %629 = vmatprep.subr.bf16.mxu0 %v856_v0  ;;  %613 = vmatprep.subr.bf16.mxu1 %v856_v0  ;;  %v699_v33 = vld [vmem:[#allocation10] sm:$0xff]   ;;  %v701_v35 = vld [vmem:[#allocation10 + $0x10] sm:$0xff]   ;;  %v702_v36 = vld [vmem:[#allocation10 + $0x18] sm:$0xff]  }
  0x65   :  { %v703_v37 = vld [vmem:[#allocation10 + $0x20] sm:$0xff]   ;;  %v704_v38 = vld [vmem:[#allocation10 + $0x28] sm:$0xff]   ;;  %v705_v49 = vld [vmem:[#allocation10 + $0x30] sm:$0xff]  }
  0x66   :  { %606 = vmatmul.mubr.msk.bf16.vlgmr.msra.gmra.mrb[0].mxu0 %vm124_vm2, %v104_v7  ;;  %v544_v39 = vld [vmem:[%s1049_s4] ss:$0 sm:$0xff]  ;;  %v706_v50 = vld [vmem:[#allocation10 + $0x38] sm:$0xff]  }
  0x67   :  { %645 = vmatprep.mubr.msk.bf16.mxu0 %vm857_vm0, %v856_v0  ;;  %614 = vmatpush3.bf16.msra.mxu1 %v685_v9  ;;  %v553_v51 = vld [vmem:[%s1051_s6] ss:$0 sm:$0xff] }
  0x68   :  { %615 = vmatprep.subr.bf16.mxu1 %v856_v0  ;;  %630 = vmatpush3.bf16.msra.mxu0 %v691_v15  ;;  %v562_v61 = vld [vmem:[%s1053_s8] ss:$0 sm:$0xff] }
  0x69   :  { %631 = vmatprep.subr.bf16.mxu0 %v856_v0 }
  0x6b   :  { %616 = vmatpush3.bf16.msra.mxu1 %v686_v10 }
  0x6c   :  { %617 = vmatprep.subr.bf16.mxu1 %v856_v0  ;;  %632 = vmatpush3.bf16.msra.mxu0 %v692_v16 }
  0x6d   :  { %633 = vmatprep.subr.bf16.mxu0 %v856_v0 }
  0x6f   :  { %618 = vmatpush3.bf16.msra.mxu1 %v687_v11 }
  0x70   :  { %619 = vmatprep.subr.bf16.mxu1 %v856_v0  ;;  %634 = vmatpush3.bf16.msra.mxu0 %v693_v17 }
  0x71   :  { %635 = vmatprep.subr.bf16.mxu0 %v856_v0 }
  0x73   :  { %620 = vmatpush3.bf16.msra.mxu1 %v688_v12 }
  0x74   :  { %621 = vmatprep.subr.bf16.mxu1 %v856_v0  ;;  %636 = vmatpush3.bf16.msra.mxu0 %v694_v18 }
  0x75   :  { %637 = vmatprep.subr.bf16.mxu0 %v856_v0 }
  0x77   :  { %622 = vmatpush3.bf16.msra.mxu1 %v689_v13 }
  0x78   :  { %623 = vmatprep.subr.bf16.mxu1 %v856_v0  ;;  %638 = vmatpush3.bf16.msra.mxu0 %v695_v19 }
  0x79   :  { %639 = vmatprep.subr.bf16.mxu0 %v856_v0 }
  0x7b   :  { %624 = vmatpush3.bf16.msra.mxu1 %v690_v14 }
  0x7c   :  { %649 = vmatprep.subr.bf16.mxu1 %v856_v0  ;;  %640 = vmatpush3.bf16.msra.mxu0 %v696_v20 }
  0x7d   :  { %641 = vmatprep.subr.bf16.mxu0 %v856_v0 }
  0x80   :  { %642 = vmatpush3.bf16.msra.mxu0 %v697_v31 }
  0x81   :  { %643 = vmatprep.subr.bf16.mxu0 %v856_v0 }
  0x84   :  { %644 = vmatpush3.bf16.msra.mxu0 %v698_v32 }
 0x139   :  { %v166_v22 = vpop.f32.mrb[0].mxu0 }
 0x13a   :  { %v167_v23 = vadd.f32 %v540_v21, %v166_v22  ;;  %v607_v24 = vpop.f32.mrb[1].mxu0 }
 0x13b   :  { %v169_v25 = vpop.f32.mrb[2].mxu0 }
 0x13c   :  { %v170_v26 = vadd.f32 %v540_v21, %v169_v25  ;;  %v608_v27 = vpop.f32.mrb[3].mxu0  ;;  %v173_v28 = vmax.f32 %v167_v23, 0.0 }
 0x13e   :  { %v174_v29 = vmax.f32 %v170_v26, 0.0 }
 0x140   :  { %v175_v30 = vpack.c.bf16 %v174_v29, %v173_v28 }
 0x142   :  { %626 = vmatmul.mubr.bf16.vlgmr.msra.gmra.mrb[0].mxu1 %v175_v30 }
 0x143   :  { %665 = vmatprep.mubr.msk.bf16.mxu1 %vm857_vm0, %v856_v0  ;;  %650 = vmatpush3.bf16.msra.mxu1 %v699_v33 }
 0x144   :  { %651 = vmatprep.subr.bf16.mxu1 %v856_v0 }
 0x147   :  { %652 = vmatpush3.bf16.msra.mxu1 %v700_v34 }
 0x148   :  { %653 = vmatprep.subr.bf16.mxu1 %v856_v0 }
 0x14b   :  { %654 = vmatpush3.bf16.msra.mxu1 %v701_v35 }
 0x14c   :  { %655 = vmatprep.subr.bf16.mxu1 %v856_v0 }
 0x14f   :  { %656 = vmatpush3.bf16.msra.mxu1 %v702_v36 }
 0x150   :  { %657 = vmatprep.subr.bf16.mxu1 %v856_v0 }
 0x153   :  { %658 = vmatpush3.bf16.msra.mxu1 %v703_v37 }
 0x154   :  { %659 = vmatprep.subr.bf16.mxu1 %v856_v0 }
 0x157   :  { %660 = vmatpush3.bf16.msra.mxu1 %v704_v38 }
 0x158   :  { %661 = vmatprep.subr.bf16.mxu1 %v856_v0 }
 0x15b   :  { %662 = vmatpush3.bf16.msra.mxu1 %v705_v49 }
 0x15c   :  { %663 = vmatprep.subr.bf16.mxu1 %v856_v0 }
 0x15f   :  { %664 = vmatpush3.bf16.msra.mxu1 %v706_v50 }
 0x215   :  { %v281_v40 = vpop.f32.mrb[0].mxu1 }
 0x216   :  { %v282_v41 = vadd.f32 %v544_v39, %v281_v40  ;;  %v627_v42 = vpop.f32.mrb[1].mxu1 }
 0x217   :  { %v284_v43 = vpop.f32.mrb[2].mxu1 }
 0x218   :  { %v285_v44 = vadd.f32 %v544_v39, %v284_v43  ;;  %v628_v45 = vpop.f32.mrb[3].mxu1  ;;  %v288_v46 = vmax.f32 %v282_v41, 0.0 }
 0x21a   :  { %v289_v47 = vmax.f32 %v285_v44, 0.0 }
 0x21c   :  { %v290_v48 = vpack.c.bf16 %v289_v47, %v288_v46 }
 0x21e   :  { %646 = vmatmul.mubr.bf16.vlgmr.msra.gmra.mrb[4].mxu0 %v290_v48 }
 0x2f1   :  { %v396_v52 = vpop.f32.mrb[4].mxu0 }
 0x2f2   :  { %v397_v53 = vadd.f32 %v553_v51, %v396_v52  ;;  %v647_v54 = vpop.f32.mrb[5].mxu0 }
 0x2f3   :  { %v399_v55 = vpop.f32.mrb[6].mxu0 }
 0x2f4   :  { %v400_v56 = vadd.f32 %v553_v51, %v399_v55  ;;  %v648_v57 = vpop.f32.mrb[7].mxu0  ;;  %v403_v58 = vmax.f32 %v397_v53, 0.0 }
 0x2f6   :  { %v404_v59 = vmax.f32 %v400_v56, 0.0 }
 0x2f8   :  { %v405_v60 = vpack.c.bf16 %v404_v59, %v403_v58 }
 0x2fa   :  { %666 = vmatmul.mubr.bf16.vlgmr.msra.gmra.mrb[4].mxu1 %v405_v60 }
 0x3cd   :  { %v511_v62 = vpop.f32.mrb[4].mxu1 }
 0x3ce   :  { %v512_v63 = vadd.f32 %v562_v61, %v511_v62  ;;  %v667_v0 = vpop.f32.mrb[5].mxu1 }
 0x3cf   :  { %v514_v1 = vpop.f32.mrb[6].mxu1 }
 0x3d0   :  { %519 = vst.msk [vmem:[#allocation11] sm:$0xff] %vm518_vm3, %v512_v63  ;;  %v515_v2 = vadd.f32 %v562_v61, %v514_v1  ;;  %v668_v3 = vpop.f32.mrb[7].mxu1 }
 0x3d2   :  { %520 = vst.msk [vmem:[#allocation11 + $0x8] sm:$0xff] %vm518_vm3, %v515_v2 }
 0x3d3   :  { %525 = vsyncadd [#allocation4], 224  ;;  %s858_s6 = smov [#allocation11]  }
 0x3d4   :  { %s526_s14 = sshll.u32 %s858_s6, 4  ;;  %s527_s14 = int_to_ptr.vmem [resolvable:$true] %s526_s14 }
 0x3d5   :  { %s817_s15 = scalar_lea.vmem %s527_s14, 32  ;;  %s821_s16 = scalar_lea.vmem %s527_s14, 256 }
 0x3d6   :  { %p818_p12 = scmp.ne.s32.totalorder %s527_s14, %s817_s15  ;;  %p822_p13 = scmp.lt.s32.totalorder %s527_s14, %s527_s14 }
 0x3d7   :  { %p823_p0 = scmp.lt.s32.totalorder %s821_s16, %s817_s15 }
 0x3d9   :  { %p824_p1 = por %p823_p0, %p822_p13 }
 0x3db   :  { %p825_p2 = pnand %p824_p1, %p818_p12 }
 0x3dd   :  { %828 = shalt.err (!%p825_p2)
}
 0x3de   :  { %s829_s18 = scalar_lea.hbm %s1054_s9, 32 }
 0x3df   :  { %p830_p3 = scmp.ne.s32.totalorder %s1054_s9, %s829_s18  ;;  %p833_p4 = scmp.lt.u32.totalorder %s829_s18, %s1054_s9 }
 0x3e1   :  { %p835_p5 = pnand %p833_p4, %p830_p3 }
 0x3e3   :  { %838 = shalt.err (!%p835_p5)
}
 0x3e4   :  { %532 = dma.vmem_to_hbm [thread:$0]  %s527_s14, 32, %s1054_s9, [#allocation4], %s852_s5, %s852_s5, %s853_s24  }
 0x3e5   :  { %845 = dma.done.wait [#allocation4], 256  }
 0x3e6   :  { %846 = vsyncadd [#allocation4], 4294967040 }
 0x3e7   :  { %536 = vsyncpa [#allocation3], 1 }
 0x3e8   :  { %537 = vsyncpa [#allocation6], 1 }
 0x3e9   :  { %538 = vsyncpa [#allocation9], 1 }
 0x3ea   :  { %539 = vsyncpa [#allocation4], 1 }

</bundles_post_ra>
